<compile_context>
chip_gen: v6e
topology: v6e:2x2x1
jax: 0.10.0
libtpu: 0.0.40
codegen_flags: <defaults>
</compile_context>

<pallas_src>
import jax
import jax.numpy as jnp
from jax.experimental import pallas as pl
from jax.experimental.pallas import tpu as pltpu


def _attention_kernel(num_heads, head_dim):
    embed_dim = num_heads * head_dim

    def kernel(hs_ref, k_ref, v_ref, mask_ref,
               wq_ref, bq_ref, wo_ref, bo_ref, out_ref):
        hs = hs_ref[0]                                   # (tq, E)    bf16
        kh = k_ref[0]                                    # (H, S, Dh) bf16, pre-projected
        vh = v_ref[0]                                    # (H, S, Dh) bf16, pre-projected
        mask = mask_ref[0, 0].astype(jnp.float32)        # (tq, S)    additive

        tq = hs.shape[0]

        # Q projection (1/sqrt(Dh) folded into wq/bq on the host);
        # bf16 MXU operands, f32 accumulation.
        q = jnp.dot(hs, wq_ref[...], preferred_element_type=jnp.float32) + bq_ref[...]

        # Single relayout to head-major (H, tq, Dh): replaces H lane-unaligned
        # head slices and lets one batched MXU einsum cover all heads.
        qh = q.astype(jnp.bfloat16).reshape(tq, num_heads, head_dim).transpose(1, 0, 2)

        # scores = q @ k^T for all heads at once (contraction over Dh).
        scores = jnp.einsum('hqd,hkd->hqk', qh, kh,
                            preferred_element_type=jnp.float32)          # (H, tq, S)
        scores = scores + mask[None, :, :]

        # Numerically-stable softmax along the key axis.  Normalization is
        # deferred until after the PV matmul so the VPU scales (H, tq, Dh)
        # elements instead of (H, tq, S).
        m = jnp.max(scores, axis=-1, keepdims=True)
        e = jnp.exp(scores - m)                                          # un-normalized, <= 1
        denom = jnp.sum(e, axis=-1, keepdims=True)                       # (H, tq, 1)
        # TODO(synk): attention dropout omitted (module default p=0.0 / eval mode).

        ctx = jnp.einsum('hqk,hkd->hqd', e.astype(jnp.bfloat16), vh,
                         preferred_element_type=jnp.float32)             # (H, tq, Dh)
        ctx = ctx * pl.reciprocal(denom, approx=True)

        # Back to (tq, E) and output projection (+ bias), f32 accumulation.
        ctx = ctx.astype(jnp.bfloat16).transpose(1, 0, 2).reshape(tq, embed_dim)
        out = jnp.dot(ctx, wo_ref[...], preferred_element_type=jnp.float32) + bo_ref[...]
        out_ref[0] = out.astype(out_ref.dtype)

    return kernel


def _vmem_limit_bytes():
    # Generation-aware scoped-VMEM limit: ~3/4 of physical VMEM, capped.
    # (v5e/v6e: 128 MiB physical -> 96 MiB; v7x: 64 MiB physical -> 48 MiB.)
    try:
        cap = pltpu.get_tpu_info().vmem_capacity_bytes
    except Exception:
        cap = 64 << 20  # conservative (v7x-sized) fallback
    return int(min(cap * 3 // 4, 96 << 20))


def bart_attention_multi(hidden_states, hidden_states_2, attention_mask_2, params,
                         num_heads, *, q_tile=128):
    """params: dict with wq, bq, wk, bk, wv, bv, wo, bo.
    Weights are stored PyTorch-style as (out, in); biases as (E,)."""
    B, T, E = hidden_states.shape
    Bk, S, Ek = hidden_states_2.shape
    assert B == Bk and E == Ek
    head_dim = E // num_heads
    assert head_dim * num_heads == E
    scaling = head_dim ** (-0.5)

    tq = min(T, q_tile)
    # If T % tq != 0, padded query rows run exp() on garbage but their writes
    # are discarded and rows are independent -> benign.
    n_qt = pl.cdiv(T, tq)

    cdt = jnp.bfloat16
    f32 = jnp.float32

    # Pre-transpose weights to (in, out); fold scaling into q_proj weight AND
    # bias (PyTorch scales the full q_proj output).  Biases stay f32.
    wq_t = (params["wq"].T * scaling).astype(cdt)
    bq = (params["bq"] * scaling).reshape(1, E).astype(f32)
    wo_t = params["wo"].T.astype(cdt)
    bo = params["bo"].reshape(1, E).astype(f32)

    # K/V projections hoisted out of the kernel: computed once per call in f32
    # by XLA (instead of once per query tile inside the kernel), then reshaped
    # head-major (B, H, S, Dh) and cast to bf16 for the kernel.
    hs2_f32 = hidden_states_2.astype(f32)
    k = jnp.dot(hs2_f32, params["wk"].T.astype(f32)) + params["bk"].astype(f32)
    v = jnp.dot(hs2_f32, params["wv"].T.astype(f32)) + params["bv"].astype(f32)
    k_h = k.reshape(B, S, num_heads, head_dim).transpose(0, 2, 1, 3).astype(cdt)
    v_h = v.reshape(B, S, num_heads, head_dim).transpose(0, 2, 1, 3).astype(cdt)

    hs = hidden_states.astype(cdt)
    # Additive mask DMA'd in bf16; clamp so masks built with finfo(f32).min do
    # not overflow to -inf in bf16 (NaN probs on fully-masked rows).
    bf16_info = jnp.finfo(jnp.bfloat16)
    mask = jnp.clip(attention_mask_2.astype(f32),
                    float(bf16_info.min), float(bf16_info.max)).astype(cdt)

    kernel = _attention_kernel(num_heads, head_dim)

    # Weight / bias blocks are grid-constant -> single-buffer them (halves
    # their VMEM footprint; matters most under v7x's 64 MiB VMEM).
    w_spec = pl.BlockSpec((E, E), lambda b, t: (0, 0), pipeline_mode=pl.Buffered(1))
    b_spec = pl.BlockSpec((1, E), lambda b, t: (0, 0), pipeline_mode=pl.Buffered(1))
    # K/V blocks only change with the batch index -> re-fetched only per batch.
    kv_spec = pl.BlockSpec((1, num_heads, S, head_dim), lambda b, t: (b, 0, 0, 0))

    out = pl.pallas_call(
        kernel,
        out_shape=jax.ShapeDtypeStruct((B, T, E), hidden_states.dtype),
        grid_spec=pltpu.PrefetchScalarGridSpec(
            num_scalar_prefetch=0,
            grid=(B, n_qt),
            in_specs=[
                pl.BlockSpec((1, tq, E), lambda b, t: (b, t, 0)),        # hidden_states
                kv_spec,                                                 # K (projected, head-major)
                kv_spec,                                                 # V (projected, head-major)
                pl.BlockSpec((1, 1, tq, S), lambda b, t: (b, 0, t, 0)),  # attention_mask_2
                w_spec, b_spec,                                          # q_proj (scaled)
                w_spec, b_spec,                                          # out_proj
            ],
            out_specs=pl.BlockSpec((1, tq, E), lambda b, t: (b, t, 0)),
        ),
        compiler_params=pltpu.CompilerParams(
            dimension_semantics=("parallel", "parallel"),
            vmem_limit_bytes=_vmem_limit_bytes()),
    )(hs, k_h, v_h, mask, wq_t, bq, wo_t, bo)

    # Module returns (attn_output, attn_weights_reshaped=None, past_key_value=None).
    return out, None, None


def _reference(hidden_states, hidden_states_2, attention_mask_2, params, num_heads):
    """Pure-JAX f32 reference mirroring the PyTorch forward."""
    B, T, E = hidden_states.shape
    S = hidden_states_2.shape[1]
    Dh = E // num_heads
    scaling = Dh ** (-0.5)

    def lin(x, w, b):
        return x @ w.T + b

    q = lin(hidden_states, params["wq"], params["bq"]) * scaling
    k = lin(hidden_states_2, params["wk"], params["bk"])
    v = lin(hidden_states_2, params["wv"], params["bv"])

    def shape(t, L):
        return t.reshape(B, L, num_heads, Dh).transpose(0, 2, 1, 3)

    q = shape(q, T).reshape(B * num_heads, T, Dh)
    k = shape(k, S).reshape(B * num_heads, S, Dh)
    v = shape(v, S).reshape(B * num_heads, S, Dh)

    w = jnp.einsum("btd,bsd->bts", q, k)
    w = w.reshape(B, num_heads, T, S) + attention_mask_2
    w = w.reshape(B * num_heads, T, S)
    w = jax.nn.softmax(w, axis=-1)
    o = jnp.einsum("bts,bsd->btd", w, v)
    o = o.reshape(B, num_heads, T, Dh).transpose(0, 2, 1, 3).reshape(B, T, E)
    return lin(o, params["wo"], params["bo"])


if __name__ == "__main__":
    B, T, S, E, H = 2, 8, 8, 32, 4
    key = jax.random.PRNGKey(0)
    keys = jax.random.split(key, 12)

    hidden_states = jax.random.normal(keys[0], (B, T, E), dtype=jnp.float32)
    hidden_states_2 = jax.random.normal(keys[1], (B, S, E), dtype=jnp.float32)
    # Additive attention mask: 0 where attended, -1e9 where masked (last 2 kv pos of batch 1).
    mask = jnp.zeros((B, 1, T, S), dtype=jnp.float32)
    mask = mask.at[1, 0, :, -2:].set(-1e9)

    scale = 0.02
    params = {
        "wq": scale * jax.random.normal(keys[2], (E, E), dtype=jnp.float32),
        "bq": scale * jax.random.normal(keys[3], (E,), dtype=jnp.float32),
        "wk": scale * jax.random.normal(keys[4], (E, E), dtype=jnp.float32),
        "bk": scale * jax.random.normal(keys[5], (E,), dtype=jnp.float32),
        "wv": scale * jax.random.normal(keys[6], (E, E), dtype=jnp.float32),
        "bv": scale * jax.random.normal(keys[7], (E,), dtype=jnp.float32),
        "wo": scale * jax.random.normal(keys[8], (E, E), dtype=jnp.float32),
        "bo": scale * jax.random.normal(keys[9], (E,), dtype=jnp.float32),
    }

    out, attn_w, past_kv = bart_attention_multi(
        hidden_states, hidden_states_2, mask, params, num_heads=H)
    out = jax.block_until_ready(out)

    ref = _reference(hidden_states, hidden_states_2, mask, params, num_heads=H)
    assert out.shape == (B, T, E)
    # Tolerance loosened for bf16 matmul operands (f32 accumulation keeps the
    # error well inside these bounds).
    assert jnp.allclose(out, ref, rtol=2e-2, atol=2e-3), "mismatch vs reference"
    assert attn_w is None and past_kv is None

    print("KERNEL_OK")
</pallas_src>

<mosaic_0001>
module attributes {stable_mosaic.version = 11 : i64} {
  func.func @kernel(%arg0: i32, %arg1: i32, %arg2: memref<1x8x32xbf16, #tpu.memory_space<vmem>>, %arg3: memref<1x4x8x8xbf16, #tpu.memory_space<vmem>>, %arg4: memref<1x4x8x8xbf16, #tpu.memory_space<vmem>>, %arg5: memref<1x1x8x8xbf16, #tpu.memory_space<vmem>>, %arg6: memref<32x32xbf16, #tpu.memory_space<vmem>>, %arg7: memref<1x32xf32, #tpu.memory_space<vmem>>, %arg8: memref<32x32xbf16, #tpu.memory_space<vmem>>, %arg9: memref<1x32xf32, #tpu.memory_space<vmem>>, %arg10: memref<1x8x32xf32, #tpu.memory_space<vmem>>) attributes {dimension_semantics = [#tpu.dimension_semantics<parallel>, #tpu.dimension_semantics<parallel>], iteration_bounds = array<i64: 2, 1>, scalar_prefetch = 0 : i64, scratch_operands = 0 : i64, tpu.core_type = #tpu.core_type<tc>, window_params = [{transform_indices = @transform_0, window_bounds = array<i64: 1, 8, 32>}, {transform_indices = @transform_1, window_bounds = array<i64: 1, 4, 8, 8>}, {transform_indices = @transform_2, window_bounds = array<i64: 1, 4, 8, 8>}, {transform_indices = @transform_3, window_bounds = array<i64: 1, 1, 8, 8>}, {pipeline_mode = #tpu.pipeline_mode<synchronous>, transform_indices = @transform_4, window_bounds = array<i64: 32, 32>}, {pipeline_mode = #tpu.pipeline_mode<synchronous>, transform_indices = @transform_5, window_bounds = array<i64: 1, 32>}, {pipeline_mode = #tpu.pipeline_mode<synchronous>, transform_indices = @transform_6, window_bounds = array<i64: 32, 32>}, {pipeline_mode = #tpu.pipeline_mode<synchronous>, transform_indices = @transform_7, window_bounds = array<i64: 1, 32>}, {transform_indices = @transform_8, window_bounds = array<i64: 1, 8, 32>}]} {
    %c0 = arith.constant 0 : index
    %c0_0 = arith.constant 0 : index
    %c0_1 = arith.constant 0 : index
    %0 = vector.load %arg2[%c0, %c0_0, %c0_1] : memref<1x8x32xbf16, #tpu.memory_space<vmem>>, vector<1x8x32xbf16>
    %1 = vector.shape_cast %0 : vector<1x8x32xbf16> to vector<8x32xbf16>
    %c0_2 = arith.constant 0 : index
    %c0_3 = arith.constant 0 : index
    %c0_4 = arith.constant 0 : index
    %c0_5 = arith.constant 0 : index
    %2 = vector.load %arg3[%c0_2, %c0_3, %c0_4, %c0_5] : memref<1x4x8x8xbf16, #tpu.memory_space<vmem>>, vector<1x4x8x8xbf16>
    %3 = vector.shape_cast %2 : vector<1x4x8x8xbf16> to vector<4x8x8xbf16>
    %c0_6 = arith.constant 0 : index
    %c0_7 = arith.constant 0 : index
    %c0_8 = arith.constant 0 : index
    %c0_9 = arith.constant 0 : index
    %4 = vector.load %arg4[%c0_6, %c0_7, %c0_8, %c0_9] : memref<1x4x8x8xbf16, #tpu.memory_space<vmem>>, vector<1x4x8x8xbf16>
    %5 = vector.shape_cast %4 : vector<1x4x8x8xbf16> to vector<4x8x8xbf16>
    %c0_10 = arith.constant 0 : index
    %c0_11 = arith.constant 0 : index
    %c0_12 = arith.constant 0 : index
    %c0_13 = arith.constant 0 : index
    %6 = vector.load %arg5[%c0_10, %c0_11, %c0_12, %c0_13] : memref<1x1x8x8xbf16, #tpu.memory_space<vmem>>, vector<1x1x8x8xbf16>
    %7 = vector.shape_cast %6 : vector<1x1x8x8xbf16> to vector<8x8xbf16>
    %8 = arith.extf %7 : vector<8x8xbf16> to vector<8x8xf32>
    %c0_14 = arith.constant 0 : index
    %c0_15 = arith.constant 0 : index
    %9 = vector.load %arg6[%c0_14, %c0_15] : memref<32x32xbf16, #tpu.memory_space<vmem>>, vector<32x32xbf16>
    %cst = arith.constant dense<0.000000e+00> : vector<8x32xf32>
    %10 = tpu.matmul %1, %9, %cst {dimension_numbers = #tpu.dot_dimension_numbers<[1], [0], [0], [1], [0, 0, 1, 1], [], []>} : vector<8x32xbf16>, vector<32x32xbf16>, vector<8x32xf32> -> vector<8x32xf32>
    %c0_16 = arith.constant 0 : index
    %c0_17 = arith.constant 0 : index
    %11 = vector.load %arg7[%c0_16, %c0_17] : memref<1x32xf32, #tpu.memory_space<vmem>>, vector<1x32xf32>
    %12 = vector.broadcast %11 : vector<1x32xf32> to vector<8x32xf32>
    %13 = arith.addf %10, %12 : vector<8x32xf32>
    %14 = arith.truncf %13 : vector<8x32xf32> to vector<8x32xbf16>
    %15 = vector.shape_cast %14 : vector<8x32xbf16> to vector<8x4x8xbf16>
    %16 = tpu.transpose %15, [1, 0, 2] : vector<8x4x8xbf16> -> vector<4x8x8xbf16>
    "tpu.trace_start"() <{level = 10 : i32, message = "hqd,hkd->hqk"}> : () -> ()
    %cst_18 = arith.constant dense<0.000000e+00> : vector<4x8x8xf32>
    %17 = tpu.matmul %16, %3, %cst_18 {dimension_numbers = #tpu.dot_dimension_numbers<[2], [2], [1], [1], [0, 0, 0, 1, 1, 1], [0], [0]>} : vector<4x8x8xbf16>, vector<4x8x8xbf16>, vector<4x8x8xf32> -> vector<4x8x8xf32>
    "tpu.trace_stop"() : () -> ()
    %18 = vector.shape_cast %8 : vector<8x8xf32> to vector<1x8x8xf32>
    %19 = vector.broadcast %18 : vector<1x8x8xf32> to vector<4x8x8xf32>
    %20 = arith.addf %17, %19 : vector<4x8x8xf32>
    %cst_19 = arith.constant dense<0xFF800000> : vector<4x8xf32>
    %21 = vector.multi_reduction <maximumf>, %20, %cst_19 [2] : vector<4x8x8xf32> to vector<4x8xf32>
    %22 = vector.shape_cast %21 : vector<4x8xf32> to vector<4x8x1xf32>
    %23 = vector.broadcast %22 : vector<4x8x1xf32> to vector<4x8x8xf32>
    %24 = arith.subf %20, %23 : vector<4x8x8xf32>
    %25 = math.exp %24 : vector<4x8x8xf32>
    %cst_20 = arith.constant dense<0.000000e+00> : vector<4x8xf32>
    %26 = vector.multi_reduction <add>, %25, %cst_20 [2] : vector<4x8x8xf32> to vector<4x8xf32>
    %27 = vector.shape_cast %26 : vector<4x8xf32> to vector<4x8x1xf32>
    %28 = arith.truncf %25 : vector<4x8x8xf32> to vector<4x8x8xbf16>
    "tpu.trace_start"() <{level = 10 : i32, message = "hqk,hkd->hqd"}> : () -> ()
    %cst_21 = arith.constant dense<0.000000e+00> : vector<4x8x8xf32>
    %29 = tpu.matmul %28, %5, %cst_21 {dimension_numbers = #tpu.dot_dimension_numbers<[2], [1], [1], [2], [0, 0, 0, 1, 1, 2], [0], [0]>} : vector<4x8x8xbf16>, vector<4x8x8xbf16>, vector<4x8x8xf32> -> vector<4x8x8xf32>
    "tpu.trace_stop"() : () -> ()
    %30 = tpu.reciprocal %27 {approx = true} : vector<4x8x1xf32> -> vector<4x8x1xf32>
    %31 = vector.broadcast %30 : vector<4x8x1xf32> to vector<4x8x8xf32>
    %32 = arith.mulf %29, %31 : vector<4x8x8xf32>
    %33 = arith.truncf %32 : vector<4x8x8xf32> to vector<4x8x8xbf16>
    %34 = tpu.transpose %33, [1, 0, 2] : vector<4x8x8xbf16> -> vector<8x4x8xbf16>
    %35 = vector.shape_cast %34 : vector<8x4x8xbf16> to vector<8x32xbf16>
    %c0_22 = arith.constant 0 : index
    %c0_23 = arith.constant 0 : index
    %36 = vector.load %arg8[%c0_22, %c0_23] : memref<32x32xbf16, #tpu.memory_space<vmem>>, vector<32x32xbf16>
    %cst_24 = arith.constant dense<0.000000e+00> : vector<8x32xf32>
    %37 = tpu.matmul %35, %36, %cst_24 {dimension_numbers = #tpu.dot_dimension_numbers<[1], [0], [0], [1], [0, 0, 1, 1], [], []>} : vector<8x32xbf16>, vector<32x32xbf16>, vector<8x32xf32> -> vector<8x32xf32>
    %c0_25 = arith.constant 0 : index
    %c0_26 = arith.constant 0 : index
    %38 = vector.load %arg9[%c0_25, %c0_26] : memref<1x32xf32, #tpu.memory_space<vmem>>, vector<1x32xf32>
    %39 = vector.broadcast %38 : vector<1x32xf32> to vector<8x32xf32>
    %40 = arith.addf %37, %39 : vector<8x32xf32>
    %c0_27 = arith.constant 0 : index
    %c0_28 = arith.constant 0 : index
    %c0_29 = arith.constant 0 : index
    %41 = vector.load %arg10[%c0_27, %c0_28, %c0_29] : memref<1x8x32xf32, #tpu.memory_space<vmem>>, vector<1x8x32xf32>
    %42 = vector.shape_cast %41 : vector<1x8x32xf32> to vector<8x32xf32>
    %43 = vector.shape_cast %40 : vector<8x32xf32> to vector<1x8x32xf32>
    tpu.vector_store %arg10[%c0_27, %c0_28, %c0_29], %43 {strides = array<i32>} : memref<1x8x32xf32, #tpu.memory_space<vmem>>, vector<1x8x32xf32>,
    return
  }
  func.func @transform_0(%arg0: i32, %arg1: i32) -> (i32, i32, i32) {
    %c0_i32 = arith.constant 0 : i32
    %c0_i32_0 = arith.constant 0 : i32
    return %arg0, %arg1, %c0_i32 : i32, i32, i32
  }
  func.func @transform_1(%arg0: i32, %arg1: i32) -> (i32, i32, i32, i32) {
    %c0_i32 = arith.constant 0 : i32
    %c0_i32_0 = arith.constant 0 : i32
    %c0_i32_1 = arith.constant 0 : i32
    %c0_i32_2 = arith.constant 0 : i32
    return %arg0, %c0_i32, %c0_i32_0, %c0_i32_1 : i32, i32, i32, i32
  }
  func.func @transform_2(%arg0: i32, %arg1: i32) -> (i32, i32, i32, i32) {
    %c0_i32 = arith.constant 0 : i32
    %c0_i32_0 = arith.constant 0 : i32
    %c0_i32_1 = arith.constant 0 : i32
    %c0_i32_2 = arith.constant 0 : i32
    return %arg0, %c0_i32, %c0_i32_0, %c0_i32_1 : i32, i32, i32, i32
  }
  func.func @transform_3(%arg0: i32, %arg1: i32) -> (i32, i32, i32, i32) {
    %c0_i32 = arith.constant 0 : i32
    %c0_i32_0 = arith.constant 0 : i32
    %c0_i32_1 = arith.constant 0 : i32
    return %arg0, %c0_i32, %arg1, %c0_i32_0 : i32, i32, i32, i32
  }
  func.func @transform_4(%arg0: i32, %arg1: i32) -> (i32, i32) {
    %c0_i32 = arith.constant 0 : i32
    %c0_i32_0 = arith.constant 0 : i32
    %c0_i32_1 = arith.constant 0 : i32
    return %c0_i32, %c0_i32_0 : i32, i32
  }
  func.func @transform_5(%arg0: i32, %arg1: i32) -> (i32, i32) {
    %c0_i32 = arith.constant 0 : i32
    %c0_i32_0 = arith.constant 0 : i32
    %c0_i32_1 = arith.constant 0 : i32
    return %c0_i32, %c0_i32_0 : i32, i32
  }
  func.func @transform_6(%arg0: i32, %arg1: i32) -> (i32, i32) {
    %c0_i32 = arith.constant 0 : i32
    %c0_i32_0 = arith.constant 0 : i32
    %c0_i32_1 = arith.constant 0 : i32
    return %c0_i32, %c0_i32_0 : i32, i32
  }
  func.func @transform_7(%arg0: i32, %arg1: i32) -> (i32, i32) {
    %c0_i32 = arith.constant 0 : i32
    %c0_i32_0 = arith.constant 0 : i32
    %c0_i32_1 = arith.constant 0 : i32
    return %c0_i32, %c0_i32_0 : i32, i32
  }
  func.func @transform_8(%arg0: i32, %arg1: i32) -> (i32, i32, i32) {
    %c0_i32 = arith.constant 0 : i32
    %c0_i32_0 = arith.constant 0 : i32
    return %arg0, %arg1, %c0_i32 : i32, i32, i32
  }
}

</mosaic_0001>

<bundles_post_ra>
// kernel: tpu_custom_call.1
= control target key start
LH: loop header
LB: loop body
LE: loop exit
PB: predicated region body
PF: predicated region fallthrough
CT: control target
= control target key end

     0   :  { %s2568_s0 = inlined_call_operand.hbm [shape: bf16[2,8,32], index: 0, kind: input, shape index: {}]   ;;  %s2569_s1 = inlined_call_operand.hbm [shape: bf16[2,4,8,8], index: 1, kind: input, shape index: {}]   ;;  %s2570_s2 = inlined_call_operand.hbm [shape: bf16[2,4,8,8], index: 2, kind: input, shape index: {}]   ;;  %s2571_s3 = inlined_call_operand.hbm [shape: bf16[2,1,8,8], index: 3, kind: input, shape index: {}]   ;;  %s2572_s4 = inlined_call_operand.hbm [shape: bf16[32,32], index: 4, kind: input, shape index: {}]   ;;  %s2573_s5 = inlined_call_operand.vmem [shape: f32[1,32], index: 5, kind: input, shape index: {}]   ;;  %s2574_s6 = inlined_call_operand.hbm [shape: bf16[32,32], index: 6, kind: input, shape index: {}]   ;;  %s2575_s7 = inlined_call_operand.vmem [shape: f32[1,32], index: 7, kind: input, shape index: {}]   ;;  %s2576_s8 = inlined_call_operand.hbm [shape: f32[2,8,32], index: 8, kind: output, shape index: {}]  }
   0x1   :  { %2589 = sst [smem:[#allocation26_spill]] %s2569_s1 }
   0x2   :  { %2590 = sst [smem:[#allocation27_spill]] %s2570_s2 }
   0x3   :  { %2591 = sst [smem:[#allocation28_spill]] %s2572_s4 }
   0x4   :  { %2592 = sst [smem:[#allocation29_spill]] %s2574_s6 }
   0x5   :  { %2593 = sst [smem:[#allocation30_spill]] %s2575_s7 }
   0x6   :  { %2594 = sst [smem:[#allocation31_spill]] %s2576_s8 }
   0x7   :  { %13 = vsyncpa [#allocation3], 0 }
   0x8   :  { %15 = vsyncpa [#allocation3 + $0x1], 0 }
   0x9   :  { %16 = vsyncpa [#allocation6], 0 }
   0xa   :  { %18 = vsyncpa [#allocation6 + $0x1], 0 }
   0xb   :  { %19 = vsyncpa [#allocation9], 0 }
   0xc   :  { %21 = vsyncpa [#allocation9 + $0x1], 0 }
   0xd   :  { %22 = vsyncpa [#allocation12], 0 }
   0xe   :  { %23 = vsyncpa [#allocation4], 0 }
   0xf   :  { %25 = vsyncpa [#allocation4 + $0x1], 0  ;;  %s2164_s27 = smov 0   ;;  %s2166_s28 = smov 0  }
  0x10   :  { %s2168_s29 = smov 0   ;;  %s2170_s30 = smov 0  }
  0x11   :  { %s2172_s9 = smov 0   ;;  %s2174_s10 = smov 0  }
  0x12 LB: > { %2595 = sst [smem:[#allocation20_spill]] %s2077_s27  ;;  %s2195_s11 = sadd.s32 4294967295, %s2097_s10   ;;  %s2097_s10 = sphi %s2174_s10, %s31_s10   ;;  %s2093_s9 = sphi %s2172_s9, %s2636_s9   ;;  %s2089_s30 = sphi %s2170_s30, %s2635_s30   ;;  %s2085_s29 = sphi %s2168_s29, %s2634_s29   ;;  %s2081_s28 = sphi %s2166_s28, %s2633_s28   ;;  %s2077_s27 = sphi %s2164_s27, %s2632_s27  }
  0x13   : > { %2596 = sst [smem:[#allocation21_spill]] %s2089_s30  ;;  %s1575_s12 = sadd.s32 4294967294, %s2097_s10  }
  0x14   : > { %p59_p0 = scmp.ne.s32.totalorder %s2085_s29, %s2081_s28  ;;  %p60_p1 = scmp.eq.s32.totalorder %s2097_s10, 0 }
  0x15   : > { %p65_p2 = scmp.ne.s32.totalorder %s2081_s28, %s2077_s27  ;;  %p2577_p3 = scmp.eq.s32.totalorder %s2195_s11, 0 }
  0x16   : > { %p255_p4 = scmp.eq.s32.totalorder %s2195_s11, 1  ;;  %p2206_p5 = por %p60_p1, %p59_p0 }
  0x17   : > { %p261_p6 = scmp.eq.s32.totalorder %s1575_s12, 1  ;;  %p2212_p7 = por %p2577_p3, %p65_p2 }
  0x18   : > { %p2216_p8 = por %p255_p4, %p59_p0  ;;  %p1576_p10 = scmp.ge.s32.totalorder %s2097_s10, 1 }
  0x19   : > { %p2220_p9 = por %p261_p6, %p65_p2  ;;  %p268_p11 = scmp.lt.s32.totalorder %s2097_s10, 3 }
  0x1a   : > { %s2599_s16 = scalar_select %p2216_p8, 1, 0 }
  0x1b   : > { %s2601_s17 = scalar_select %p2220_p9, 1, 0 }
  0x1c   : > { %2600 = sst [smem:[#allocation22_spill]] %s2599_s16  ;;  %p2226_p12 = pnand %p1576_p10, %p268_p11 }
  0x1d   : > { %2602 = sst [smem:[#allocation23_spill]] %s2601_s17  ;;  %s2099_s19 = smov [#allocation10]  }
  0x1e   : > { %s280_s20 = sshll.u32 %s2099_s19, 4  ;;  %p1724_p13 = pneg %p2226_p12  ;;  %s281_s20 = int_to_ptr.vmem [resolvable:$true] %s280_s20 }
  0x1f   : > { %s43_s22 = sadd.s32 1, %s2093_s9  ;;  %s2242_s23 = sand.u32 1, %s2085_s29  }
  0x20   : > { %p2236_p4 = pnand %p1724_p13, %p2577_p3  ;;  %p2244_p2 = scmp.ge.s32.totalorder %s43_s22, 2 }
  0x21   : > { %s1848_s25 = scalar_lea.vmem %s281_s20, 256  ;;  %p1856_p0 = scmp.lt.s32.totalorder %s281_s20, %s281_s20 }
  0x22   : > { %p1839_p6 = pneg %p2236_p4  ;;  %p1849_p10 = scmp.ne.s32.totalorder %s281_s20, %s1848_s25 }
  0x23   : > { %p1857_p3 = scmp.lt.s32.totalorder %s1848_s25, %s1848_s25 }
  0x24   : > { %p1851_p11 = pnand %p1849_p10, %p1839_p6 }
  0x25   : > { %p1858_p1 = por %p1857_p3, %p1856_p0 }
  0x26   : > { %p1852_p13 = pneg %p1851_p11 }
  0x28   : > { %p1859_p9 = pnand %p1858_p1, %p1852_p13 }
  0x2a   : > { %1862 = shalt.err (!%p1859_p9)
}
  0x2b   : > { %s2583_s26 = smov 64   ;;  %s2585_s12 = smov 4  }
  0x2c   : > { %s2606_s4 = sld [smem:[#allocation28_spill]]  ;;  %s2638_s22 = smov (%p2244_p2, %s43_s22), 0 }
  0x2d   : > { %2607 = sst [smem:[#allocation24_spill]] %s2638_s22  ;;  %p2608_p3 = scmp.lt.s32.totalorder %s2097_s10, 2 }
  0x2e   : > { %s2588_s17 = sand.u32 1, %s2097_s10   ;;  %s47_s27 = ssub.s32 %s2093_s9, %s2638_s22 }
  0x2f   : > { %p2269_p9 = pnand %p2608_p3, %p2206_p5  ;;  %p50_p0 = scmp.eq.s32.totalorder %s47_s27, 0 }
  0x30   : > { %s1582_s8 = sshll.u32 %s2242_s23, 4  ;;  %s1618_s7 = sshll.u32 %s2093_s9, 8 }
  0x31   : > { %s2610_s16 = sadd.s32 1, %s2085_s29  ;;  %s2612_s1 = sld [smem:[#allocation26_spill]] }
  0x32   : > { %1727 = dma.hbm_to_vmem [thread:$0]  (!%p2236_p4), %s2606_s4, 256, %s281_s20, [#allocation9], %s2583_s26, %s2583_s26, %s2585_s12  }
  0x33   : > { %s2281_s19 = scalar_select %p50_p0, %s2085_s29, %s2610_s16  }
  0x34   : > { %s336_s25 = scalar_lea.vmem [#allocation5], %s1582_s8  ;;  %s2613_s2 = sld [smem:[#allocation27_spill]] }
  0x35   : > { %2611 = sst [smem:[#allocation25_spill]] %s2281_s19  ;;  %s343_s26 = sshll.u32 %s336_s25, 4  ;;  %s344_s26 = int_to_ptr.vmem [resolvable:$true] %s343_s26 }
  0x36   : > { %s2293_s22 = scalar_lea.sflag [#allocation6], %s2588_s17  ;;  %p1865_p5 = pneg %p2269_p9 }
  0x37   : > { %s342_s14 = scalar_lea.hbm %s2612_s1, %s1618_s7  ;;  %s1876_s27 = scalar_lea.vmem %s344_s26, 256 }
  0x38   : > { %p1877_p1 = scmp.ne.s32.totalorder %s344_s26, %s1876_s27  ;;  %s2102_s16 = smov [#allocation5]  }
  0x39   : > { %s1881_s20 = sshll.u32 %s2102_s16, 4  ;;  %s1882_s20 = int_to_ptr.vmem [resolvable:$false] %s1881_s20 }
  0x3a   : > { %s2289_s30 = scalar_lea.hbm %s2613_s2, %s1618_s7  ;;  %p1879_p2 = pnand %p1877_p1, %p1865_p5 }
  0x3b   : > { %s1883_s24 = scalar_lea.vmem %s1882_s20, 512  ;;  %p1884_p11 = scmp.lt.s32.totalorder %s344_s26, %s1882_s20 }
  0x3c   : > { %p1880_p10 = pneg %p1879_p2  ;;  %p1885_p13 = scmp.lt.s32.totalorder %s1883_s24, %s1876_s27 }
  0x3e   : > { %p1886_p3 = por %p1885_p13, %p1884_p11 }
  0x40   : > { %p1887_p0 = pnand %p1886_p3, %p1880_p10 }
  0x42   : > { %1890 = shalt.err (!%p1887_p0)
}
  0x43   : > { %s2614_s4 = smov 4   ;;  %s2615_s7 = smov 64  }
  0x44   : > { %1737 = dma.hbm_to_vmem [thread:$0]  (!%p2269_p9), %s342_s14, 256, %s344_s26, %s2293_s22, %s2615_s7, %s2615_s7, %s2614_s4  }
  0x45   : > { %s357_s12 = scalar_lea.vmem [#allocation7], %s1582_s8  ;;  %s2103_s16 = smov [#allocation11]  }
  0x46   : > { %s364_s25 = sshll.u32 %s357_s12, 4  ;;  %s296_s17 = sshll.u32 %s2103_s16, 4  ;;  %s2306_s25 = int_to_ptr.vmem [resolvable:$true] %s364_s25  ;;  %s297_s17 = int_to_ptr.vmem [resolvable:$true] %s296_s17 }
  0x47   : > { %s1902_s20 = scalar_lea.vmem %s297_s17, 256  ;;  %p1910_p11 = scmp.lt.s32.totalorder %s297_s17, %s297_s17 }
  0x48   : > { %p1903_p1 = scmp.ne.s32.totalorder %s297_s17, %s1902_s20  ;;  %p1911_p13 = scmp.lt.s32.totalorder %s1902_s20, %s1902_s20 }
  0x4a   : > { %p1905_p2 = pnand %p1903_p1, %p1839_p6  ;;  %p1912_p3 = por %p1911_p13, %p1910_p11 }
  0x4c   : > { %p1906_p10 = pneg %p1905_p2 }
  0x4e   : > { %p1913_p0 = pnand %p1912_p3, %p1906_p10 }
  0x50   : > { %1916 = shalt.err (!%p1913_p0)
}
  0x51   : > { %s2616_s6 = sld [smem:[#allocation29_spill]]  ;;  %s1580_s14 = sshll.u32 %s2242_s23, 2 }
  0x52   : > { %s1581_s27 = sshll.u32 %s2093_s9, 6  ;;  %s317_s21 = scalar_lea.vmem [#allocation2], %s1580_s14 }
  0x53   : > { %s323_s16 = scalar_lea.hbm %s2568_s0, %s1581_s27  ;;  %s325_s20 = sshll.u32 %s317_s21, 4  ;;  %s326_s20 = int_to_ptr.vmem [resolvable:$true] %s325_s20 }
  0x54   : > { %s2329_s8 = scalar_lea.hbm %s2571_s3, %s1581_s27  ;;  %s314_s26 = scalar_lea.sflag [#allocation3], %s2242_s23 }
  0x55   : > { %s1930_s19 = scalar_lea.vmem %s326_s20, 64 }
  0x56   : > { %p1931_p6 = scmp.ne.s32.totalorder %s326_s20, %s1930_s19 }
  0x57   : > { %1730 = dma.hbm_to_vmem [thread:$0]  (!%p2236_p4), %s2616_s6, 256, %s297_s17, [#allocation12], %s2615_s7, %s2615_s7, %s2614_s4  }
  0x58   : > { %p1933_p4 = pnand %p1931_p6, %p1865_p5  ;;  %s2104_s17 = smov [#allocation2]  }
  0x59   : > { %s1935_s6 = sshll.u32 %s2104_s17, 4  ;;  %s1936_s6 = int_to_ptr.vmem [resolvable:$false] %s1935_s6 }
  0x5a   : > { %p1934_p1 = pneg %p1933_p4  ;;  %s1937_s24 = scalar_lea.vmem %s1936_s6, 128 }
  0x5b   : > { %p1938_p2 = scmp.lt.s32.totalorder %s326_s20, %s1936_s6  ;;  %p1939_p10 = scmp.lt.s32.totalorder %s1937_s24, %s1930_s19 }
  0x5d   : > { %p1940_p11 = por %p1939_p10, %p1938_p2 }
  0x5f   : > { %p1941_p13 = pnand %p1940_p11, %p1934_p1 }
  0x61   : > { %1944 = shalt.err (!%p1941_p13)
}
  0x62   : > { %1734 = dma.hbm_to_vmem [thread:$0]  (!%p2269_p9), %s323_s16, 64, %s326_s20, %s314_s26  }
  0x63   : > { %s1958_s1 = scalar_lea.vmem %s2306_s25, 256  ;;  %s2105_s2 = smov [#allocation7]  }
  0x64   : > { %p1959_p3 = scmp.ne.s32.totalorder %s2306_s25, %s1958_s1  ;;  %s1963_s27 = sshll.u32 %s2105_s2, 4  ;;  %s1964_s27 = int_to_ptr.vmem [resolvable:$false] %s1963_s27 }
  0x65   : > { %s1965_s6 = scalar_lea.vmem %s1964_s27, 512  ;;  %p1966_p4 = scmp.lt.s32.totalorder %s2306_s25, %s1964_s27 }
  0x66   : > { %p1961_p0 = pnand %p1959_p3, %p1865_p5  ;;  %p1967_p1 = scmp.lt.s32.totalorder %s1965_s6, %s1958_s1 }
  0x68   : > { %p1962_p6 = pneg %p1961_p0  ;;  %p1968_p2 = por %p1967_p1, %p1966_p4 }
  0x6a   : > { %p1969_p10 = pnand %p1968_p2, %p1962_p6 }
  0x6c   : > { %1972 = shalt.err (!%p1969_p10)
}
  0x6d   : > { %1740 = dma.hbm_to_vmem [thread:$0]  (!%p2269_p9), %s2289_s30, 256, %s2306_s25, %s2293_s22, %s2615_s7, %s2615_s7, %s2614_s4  }
  0x6e   : > { %s378_s19 = scalar_lea.vmem [#allocation8], %s1580_s14  ;;  %s2617_s16 = sand.u32 1, %s2097_s10  }
  0x6f   : > { %s386_s12 = sshll.u32 %s378_s19, 4  ;;  %s375_s21 = scalar_lea.sflag [#allocation9], %s2617_s16  ;;  %s387_s12 = int_to_ptr.vmem [resolvable:$true] %s386_s12 }
  0x70   : > { %s1986_s20 = scalar_lea.vmem %s387_s12, 64  ;;  %s2106_s26 = smov [#allocation8]  }
  0x71   : > { %p1987_p11 = scmp.ne.s32.totalorder %s387_s12, %s1986_s20  ;;  %s1991_s17 = sshll.u32 %s2106_s26, 4  ;;  %s1992_s17 = int_to_ptr.vmem [resolvable:$false] %s1991_s17 }
  0x72   : > { %s1993_s24 = scalar_lea.vmem %s1992_s17, 128  ;;  %p1994_p0 = scmp.lt.s32.totalorder %s387_s12, %s1992_s17 }
  0x73   : > { %p1989_p13 = pnand %p1987_p11, %p1865_p5  ;;  %p1995_p6 = scmp.lt.s32.totalorder %s1993_s24, %s1986_s20 }
  0x75   : > { %p1990_p3 = pneg %p1989_p13  ;;  %p1996_p4 = por %p1995_p6, %p1994_p0 }
  0x77   : > { %p1997_p1 = pnand %p1996_p4, %p1990_p3 }
  0x79   : > { %2000 = shalt.err (!%p1997_p1)
}
  0x7a   : > { %1743 = dma.hbm_to_vmem [thread:$0]  (!%p2269_p9), %s2329_s8, 64, %s387_s12, %s375_s21  }
  0x7b   : > { %395 = sbr.rel (%p2226_p12) target bundleno = 1406 (0x57e), region = 52  ;;  %s2364_s30 = sand.u32 (!%p2226_p12), 1, %s2081_s28  }
  0x7c   : > { %s1591_s22 = sshll.u32 (!%p2226_p12), %s2364_s30, 2  ;;  %s398_s23 = scalar_lea.sflag (!%p2226_p12), [#allocation3], %s2364_s30 }
  0x7d   : > { %s401_s4 = scalar_lea.vmem (!%p2226_p12), [#allocation2], %s1591_s22 }
  0x80   : > { %2052 = dma.done.wait (%p2212_p7), %s398_s23, 64  }
  0x81   : > { %2054 = vsyncadd (%p2212_p7), %s398_s23, 4294967232  ;;  %s406_s13 = sand.u32 1, %s2195_s11   ;;  %s1592_s18 = sshll.u32 %s2364_s30, 4 }
  0x82   : > { %s407_s7 = scalar_lea.sflag [#allocation6], %s406_s13  ;;  %s2374_s25 = scalar_lea.vmem [#allocation5], %s1592_s18 }
  0x83   : > { %2056 = dma.done.wait (%p2212_p7), %s407_s7, 512  }
  0x84   : > { %2058 = vsyncadd (%p2212_p7), %s407_s7, 4294966784  ;;  %s2380_s14 = scalar_lea.vmem [#allocation7], %s1592_s18  ;;  %s425_s8 = scalar_lea.sflag [#allocation9], %s406_s13 }
  0x85   : > { %s2382_s1 = scalar_lea.vmem [#allocation8], %s1591_s22 }
  0x86   : > { %2060 = dma.done.wait (%p2212_p7), %s425_s8, 64  }
  0x87   : > { %2062 = vsyncadd (%p2212_p7), %s425_s8, 4294967232  ;;  %p2618_p12 = scmp.eq.s32.totalorder %s2195_s11, 0 }
  0x89   : > { %2064 = dma.done.wait (%p2618_p12), [#allocation9], 256   ;;  %p2619_p9 = pmov %p2618_p12 }
  0x8b   : > { %2066 = vsyncadd (%p2619_p9), [#allocation9], 4294967040  ;;  %p2620_p5 = pmov %p2619_p9 }
  0x8d   : > { %2068 = dma.done.wait (%p2620_p5), [#allocation12], 256   ;;  %p2621_p2 = pmov %p2620_p5 }
  0x8e   : > { %v2107_v0 = vmov 0.0   ;;  %vm2108_vm0 = vmmov 0   ;;  %v1817_v1 = vld [vmem:[#allocation10 + $0x8] sm:$0xff]   ;;  %v1818_v2 = vld [vmem:[#allocation10] sm:$0xff]   ;;  %v485_v3 = vld [vmem:[%s401_s4] sm:$0xf]  ;;  %v574_v17 = vlaneseq }
  0x8f   : > { %2070 = vsyncadd (%p2621_p2), [#allocation12], 4294967040  ;;  %1642 = vmatprep.subr.bf16.mxu0 %v2107_v0  ;;  %1646 = vmatprep.mubr.msk.bf16.mxu0 %vm2108_vm0, %v2107_v0  ;;  %vm519_vm1 = vcmask 261120   ;;  %v1598_v4 = vld [vmem:[%s2573_s5] ss:$0 sm:$0xff]  ;;  %s2109_s2 = smov 104  }
  0x90   : > { %1650 = vmatprep.subr.bf16.mxu1 %v2107_v0  ;;  %1652 = vmatprep.mubr.msk.bf16.mxu1 %vm2108_vm0, %v2107_v0  ;;  %s2110_s27 = smov 120   ;;  %s2111_s6 = smov 112   ;;  %v486_v11 = vld [vmem:[%s2374_s25] sm:$0xf]  ;;  %vm732_vm2 = vcmask 64512   ;;  %v575_v21 = vshrl.u32 %v574_v17, 7 }
  0x91   : > { %1643 = vmatpush3.bf16.msra.mxu0 %v1817_v1  ;;  %v487_v12 = vld [vmem:[%s2374_s25 + $0x4] sm:$0xf]  ;;  %v737_v13 = vsel %vm732_vm2, %v486_v11, 0  ;;  %v2112_v15 = vmov 1983009808   ;;  %v2114_v38 = vmov 0  }
  0x92   : > { %1644 = vmatprep.subr.bf16.mxu0 %v2107_v0  ;;  %v783_v14 = vsel %vm732_vm2, %v487_v12, 0  ;;  %1651 = vmatpush3.bf16.xpose.msra.mxu1 %v737_v13  ;;  %v572_v16 = vunpack.c.l.s4 %v2112_v15  ;;  %v2113_v18 = vmov 1934713408   ;;  %v489_v11 = vld [vmem:[%s2374_s25 + $0xc] sm:$0xf]  ;;  %vm960_vm3 = vcmask 1043456  }
  0x93   : > { %1662 = vmatprep.subr.bf16.mxu1 %v2107_v0  ;;  %v589_v19 = vunpack.c.l.s4 %v2113_v18  ;;  %v875_v17 = vsel %vm732_vm2, %v489_v11, 0  ;;  %s2115_s19 = smov 8   ;;  %s2116_s12 = smov 16   ;;  %vm1321_vm4 = vcmask 130048   ;;  %vm1324_vm5 = vcmask 195584  }
  0x94   : > { %v573_v20 = vunpack.c.0.s8 %v572_v16  ;;  %s2622_s16 = sld [smem:[#allocation21_spill]]  ;;  %s2117_s21 = smov 24  }
  0x95   : > { %1645 = vmatpush3.bf16.msra.mxu0 %v1818_v2  ;;  %v590_v22 = vunpack.c.0.s8 %v589_v19  ;;  %s1597_s26 = sshll.u32 %s2364_s30, 3  ;;  %s2624_s22 = sld [smem:[#allocation30_spill]] }
  0x96   : > { %1656 = vmatprep.subr.bf16.mxu0 %v2107_v0  ;;  %v2416_v23 = vsub.s32 %v573_v20, %v575_v21  ;;  %s483_s4 = scalar_lea.vmem [#allocation13], %s1597_s26  ;;  %s1394_s8 = scalar_lea.sflag [#allocation4], %s2364_s30 }
  0x97   : > { %v2419_v27 = vsub.s32 %v590_v22, %v575_v21  ;;  %s1408_s13 = sshll.u32 %s483_s4, 4  ;;  %s2118_s11 = smov [#allocation13]   ;;  %s2521_s13 = int_to_ptr.vmem [resolvable:$true] %s1408_s13 }
  0x98   : > { %1647 = vmatmul.mubr.msk.bf16.vlgmr.msra.gmra.mxu0 %vm519_vm1, %v485_v3  ;;  %s2005_s15 = sshll.u32 %s2118_s11, 4  ;;  %s2006_s15 = int_to_ptr.vmem [resolvable:$false] %s2005_s15 }
  0x99   : > { %1658 = vmatprep.mubr.msk.bf16.mxu0 %vm2108_vm0, %v2107_v0  ;;  %1657 = vmatpush3.bf16.xpose.msra.mxu0 %v783_v14  ;;  %p2008_p13 = scmp.lt.s32.totalorder %s2521_s13, %s2006_s15 }
  0x9a   : > { %1668 = vmatprep.subr.bf16.mxu0 %v2107_v0  ;;  %s1615_s23 = sshll.u32 %s2622_s16, 7 }
 0x158   : > { %v557_v5 = vpop.f32.mrf.mxu0 }
 0x159   : > { %v558_v6 = vadd.f32 %v1598_v4, %v557_v5 }
 0x15a   : > { %v1648_v7 = vpop.f32.mrf.mxu0 }
 0x15b   : > { %v563_v8 = vpack.c.bf16 %v558_v6, %v558_v6 }
 0x15c   : > { %v560_v9 = vpop.f32.mrf.mxu0 }
 0x15d   : > { %569 = vrot.lane.b32.xlu1 %v563_v8, %s2109_s2  ;;  %565 = vrot.lane.b32.xlu0 %v563_v8, %s2110_s27  ;;  %v577_v34 = vrot.slane %v563_v8, %v2416_v23  ;;  %v488_v9 = vld [vmem:[%s2374_s25 + $0x8] sm:$0xf]  ;;  %s2625_s25 = sld [smem:[#allocation31_spill]]  ;;  %s2007_s2 = scalar_lea.vmem %s2006_s15, 256 }
 0x15e   : > { %v1649_v10 = vpop.f32.mrf.mxu0  ;;  %v829_v13 = vsel %vm732_vm2, %v488_v9, 0 }
 0x161   : > { %567 = vrot.lane.b32.xlu0 %v563_v8, %s2111_s6 }
 0x1cf   : > { %v570_v24 = vpop.permute.xlu1 %569  ;;  %v566_v25 = vpop.permute.xlu0 %565 }
 0x1d0   : > { %v619_v26 = vrot.slane %v570_v24, %v2416_v23  ;;  %v611_v28 = vrot.slane %v566_v25, %v2416_v23  ;;  %v494_v25 = vld [vmem:[%s2382_s1] sm:$0xf]  ;;  %s2001_s1 = scalar_lea.vmem %s2521_s13, 128 }
 0x1d1   : > { %p2002_p7 = scmp.ne.s32.totalorder %s2521_s13, %s2001_s1  ;;  %p2009_p3 = scmp.lt.s32.totalorder %s2007_s2, %s2001_s1 }
 0x1d2   : > { %v620_v29 = vcombine.low %v611_v28, %v619_v26  ;;  %v621_v30 = vcombine.high %v611_v28, %v619_v26  ;;  %v495_v26 = vunpack.c.l.bf16 %v494_v25 }
 0x1d3   : > { %v568_v31 = vpop.permute.xlu0 %567  ;;  %p2003_p10 = pnand %p2002_p7, %p2216_p8  ;;  %p2010_p0 = por %p2009_p3, %p2008_p13 }
 0x1d4   : > { %v628_v32 = vrot.slane %v620_v29, %v2419_v27  ;;  %v585_v33 = vrot.slane %v568_v31, %v2416_v23  ;;  %v635_v35 = vrot.slane %v621_v30, %v2419_v27 }
 0x1d5   : > { %p2004_p11 = pneg %p2003_p10 }
 0x1d6   : > { %v586_v36 = vcombine.low %v577_v34, %v585_v33  ;;  %v587_v37 = vcombine.high %v577_v34, %v585_v33  ;;  %v636_v39 = vcombine.high %v628_v32, %v2114_v38  ;;  %v637_v42 = vcombine.high %v635_v35, %v2114_v38 }
 0x1d7   : > { %v643_v43 = vshrl.u32 %v628_v32, 16  ;;  %v659_v49 = vshrl.u32 %v635_v35, 16  ;;  %p2011_p6 = pnand %p2010_p0, %p2004_p11 }
 0x1d8   : > { %v594_v40 = vrot.slane %v586_v36, %v2419_v27  ;;  %v601_v41 = vrot.slane %v587_v37, %v2419_v27  ;;  %v651_v48 = vshrl.u32 %v636_v39, 16  ;;  %v667_v56 = vshrl.u32 %v637_v42, 16 }
 0x1da   : > { %v602_v44 = vcombine.high %v594_v40, %v2114_v38  ;;  %v603_v45 = vcombine.high %v601_v41, %v2114_v38  ;;  %v640_v46 = vpack.i.b16 %v628_v32, %v594_v40  ;;  %v642_v47 = vshrl.u32 %v594_v40, 16 }
 0x1db   : > { %v656_v50 = vpack.i.b16 %v635_v35, %v601_v41  ;;  %v658_v51 = vshrl.u32 %v601_v41, 16 }
 0x1dc   : > { %v644_v52 = vpack.i.b16 %v643_v43, %v642_v47  ;;  %v648_v53 = vpack.i.b16 %v636_v39, %v602_v44  ;;  %v650_v54 = vshrl.u32 %v602_v44, 16  ;;  %v664_v55 = vpack.i.b16 %v637_v42, %v603_v45 }
 0x1dd   : > { %v660_v57 = vpack.i.b16 %v659_v49, %v658_v51  ;;  %v666_v58 = vshrl.u32 %v603_v45, 16  ;;  %v670_v59 = vcombine.low %v640_v46, %v656_v50 }
 0x1de   : > { %v652_v60 = vpack.i.b16 %v651_v48, %v650_v54  ;;  %v678_v61 = vcombine.low %v648_v53, %v664_v55  ;;  %v490_v53 = vld [vmem:[%s2380_s14] sm:$0xf]  ;;  %v491_v54 = vld [vmem:[%s2380_s14 + $0x4] sm:$0xf] }
 0x1df   : > { %v668_v62 = vpack.i.b16 %v667_v56, %v666_v58  ;;  %v695_v63 = vcombine.low %v644_v52, %v660_v57  ;;  %v677_v1 = vrot.slane %v670_v59, %v2416_v23  ;;  %v962_v55 = vsel %vm960_vm3, %v490_v53, 0 }
 0x1e0   : > { %v685_v2 = vrot.slane %v678_v61, %v2416_v23  ;;  %v1008_v56 = vsel %vm960_vm3, %v491_v54, 0 }
 0x1e1   : > { %v703_v3 = vcombine.low %v652_v60, %v668_v62  ;;  %v702_v5 = vrot.slane %v695_v63, %v2416_v23 }
 0x1e2   : > { %v686_v4 = vcombine.low %v677_v1, %v685_v2 }
 0x1e3   : > { %v710_v6 = vrot.slane %v703_v3, %v2416_v23 }
 0x1e4   : > { %v693_v7 = vrot.slane %v686_v4, %v2419_v27 }
 0x1e5   : > { %v711_v8 = vcombine.low %v702_v5, %v710_v6  ;;  %v492_v6 = vld [vmem:[%s2380_s14 + $0x8] sm:$0xf] }
 0x1e6   : > { %v723_v14 = vshrl.u32 %v693_v7, 16  ;;  %v694_v19 = vcombine.high %v693_v7, %v2114_v38  ;;  %v1054_v11 = vsel %vm960_vm3, %v492_v6, 0 }
 0x1e7   : > { %v718_v10 = vrot.slane %v711_v8, %v2419_v27  ;;  %v493_v8 = vld [vmem:[%s2380_s14 + $0xc] sm:$0xf]  ;;  %s2519_s14 = scalar_lea.hbm %s2625_s25, %s1615_s23 }
 0x1e8   : > { %v729_v22 = vshrl.u32 %v694_v19, 16 }
 0x1e9   : > { %v722_v12 = vpack.i.b16 %v718_v10, %v693_v7  ;;  %v724_v15 = vshrl.u32 %v718_v10, 16  ;;  %v719_v18 = vcombine.high %v718_v10, %v2114_v38 }
 0x1eb   : > { %1653 = vmatmul.mubr.msk.bf16.vlgmr.msra.gmra.mxu1 %vm732_vm2, %v722_v12  ;;  %v725_v16 = vpack.i.b16 %v724_v15, %v723_v14  ;;  %v730_v20 = vshrl.u32 %v719_v18, 16  ;;  %v728_v21 = vpack.i.b16 %v719_v18, %v694_v19  ;;  %v1100_v15 = vsel %vm960_vm3, %v493_v8, 0 }
 0x1ec   : > { %1663 = vmatpush3.bf16.xpose.msra.mxu1 %v829_v13  ;;  %1664 = vmatprep.mubr.msk.bf16.mxu1 %vm2108_vm0, %v2107_v0 }
 0x1ed   : > { %1659 = vmatmul.mubr.msk.bf16.vlgmr.msra.gmra.mxu0 %vm732_vm2, %v725_v16  ;;  %1674 = vmatprep.subr.bf16.mxu1 %v2107_v0  ;;  %v731_v24 = vpack.i.b16 %v730_v20, %v729_v22  ;;  %v1819_v22 = vld [vmem:[#allocation11 + $0x8] sm:$0xff]  }
 0x1ee   : > { %1669 = vmatpush3.bf16.xpose.msra.mxu0 %v875_v17  ;;  %1670 = vmatprep.mubr.msk.bf16.mxu0 %vm2108_vm0, %v2107_v0 }
 0x1ef   : > { %1680 = vmatprep.subr.bf16.mxu0 %v2107_v0 }
 0x1f3   : > { %1665 = vmatmul.mubr.msk.bf16.vlgmr.msra.gmra.mxu1 %vm732_vm2, %v728_v21 }
 0x1f4   : > { %1676 = vmatprep.mubr.msk.bf16.mxu1 %vm2108_vm0, %v2107_v0  ;;  %1675 = vmatpush3.bf16.msra.mxu1 %v962_v55 }
 0x1f5   : > { %1671 = vmatmul.mubr.msk.bf16.vlgmr.msra.gmra.mxu0 %vm732_vm2, %v731_v24  ;;  %1686 = vmatprep.subr.bf16.mxu1 %v2107_v0 }
 0x1f6   : > { %1682 = vmatprep.mubr.msk.bf16.mxu0 %vm2108_vm0, %v2107_v0  ;;  %1681 = vmatpush3.bf16.msra.mxu0 %v1008_v56 }
 0x1f7   : > { %1692 = vmatprep.subr.bf16.mxu0 %v2107_v0 }
 0x2ab   : > { %v773_v28 = vpop.f32.mrf.mxu1 }
 0x2ac   : > { %v774_v29 = vadd.f32 %v773_v28, %v495_v26 }
 0x2ad   : > { %v1654_v30 = vpop.f32.mrf.mxu1  ;;  %v819_v31 = vpop.f32.mrf.mxu0 }
 0x2ae   : > { %v820_v32 = vadd.f32 %v819_v31, %v495_v26  ;;  %v917_v33 = vsel %vm732_vm2, %v774_v29, -inf }
 0x2af   : > { %918 = vmax.xlane.f32.xlu1 %v917_v33  ;;  %v776_v34 = vpop.f32.mrf.mxu1  ;;  %v1660_v35 = vpop.f32.mrf.mxu0 }
 0x2b0   : > { %v920_v36 = vsel %vm732_vm2, %v820_v32, -inf }
 0x2b1   : > { %v1655_v37 = vpop.f32.mrf.mxu1  ;;  %921 = vmax.xlane.f32.xlu0 %v920_v36  ;;  %v822_v39 = vpop.f32.mrf.mxu0 }
 0x2b3   : > { %v1661_v40 = vpop.f32.mrf.mxu0  ;;  %v865_v41 = vpop.f32.mrf.mxu1 }
 0x2b4   : > { %v866_v42 = vadd.f32 %v865_v41, %v495_v26 }
 0x2b5   : > { %v1666_v43 = vpop.f32.mrf.mxu1  ;;  %v911_v44 = vpop.f32.mrf.mxu0 }
 0x2b6   : > { %v912_v45 = vadd.f32 %v911_v44, %v495_v26  ;;  %v923_v46 = vsel %vm732_vm2, %v866_v42, -inf }
 0x2b7   : > { %v868_v47 = vpop.f32.mrf.mxu1  ;;  %924 = vmax.xlane.f32.xlu0 %v923_v46  ;;  %v1672_v48 = vpop.f32.mrf.mxu0 }
 0x2b8   : > { %v926_v49 = vsel %vm732_vm2, %v912_v45, -inf }
 0x2b9   : > { %v1667_v50 = vpop.f32.mrf.mxu1  ;;  %927 = vmax.xlane.f32.xlu1 %v926_v49  ;;  %v914_v51 = vpop.f32.mrf.mxu0 }
 0x2bb   : > { %v1673_v52 = vpop.f32.mrf.mxu0 }
 0x338   : > { %v919_v57 = vpop.xlane.xlu1 %918 }
 0x339   : > { %v929_v58 = vsub.f32 %v774_v29, %v919_v57 }
 0x33a   : > { %v922_v59 = vpop.xlane.xlu0 %921 }
 0x33b   : > { %v933_v60 = vmul.f32 1.442695, %v929_v58  ;;  %v930_v61 = vsub.f32 %v820_v32, %v922_v59 }
 0x33d   : > { %1821 = vpow2.f32 %v933_v60  ;;  %v935_v62 = vmul.f32 1.442695, %v930_v61 }
 0x33f   : > { %1823 = vpow2.f32 %v935_v62 }
 0x340   : > { %v925_v63 = vpop.xlane.xlu0 %924 }
 0x341   : > { %v931_v1 = vsub.f32 %v866_v42, %v925_v63 }
 0x342   : > { %v928_v2 = vpop.xlane.xlu1 %927 }
 0x343   : > { %v937_v3 = vmul.f32 1.442695, %v931_v1  ;;  %v932_v4 = vsub.f32 %v912_v45, %v928_v2 }
 0x345   : > { %1825 = vpow2.f32 %v937_v3  ;;  %v939_v5 = vmul.f32 1.442695, %v932_v4 }
 0x347   : > { %1827 = vpow2.f32 %v939_v5 }
 0x34a   : > { %v1822_v7 = vpop.eup %1821 }
 0x34b   : > { %v941_v9 = vsel %vm732_vm2, %v1822_v7, 0.0  ;;  %v953_v10 = vpack.c.bf16 %v1822_v7, %v1822_v7 }
 0x34c   : > { %v1824_v12 = vpop.eup %1823  ;;  %942 = vadd.xlane.f32.xlu0 %v941_v9 }
 0x34d   : > { %1677 = vmatmul.mubr.msk.bf16.vlgmr.msra.gmra.mxu1 %vm732_vm2, %v953_v10  ;;  %v944_v13 = vsel %vm732_vm2, %v1824_v12, 0.0  ;;  %v954_v14 = vpack.c.bf16 %v1824_v12, %v1824_v12 }
 0x34e   : > { %945 = vadd.xlane.f32.xlu1 %v944_v13  ;;  %1687 = vmatpush3.bf16.msra.mxu1 %v1054_v11 }
 0x34f   : > { %1683 = vmatmul.mubr.msk.bf16.vlgmr.msra.gmra.mxu0 %vm732_vm2, %v954_v14  ;;  %1688 = vmatprep.mubr.msk.bf16.mxu1 %vm2108_vm0, %v2107_v0 }
 0x350   : > { %1693 = vmatpush3.bf16.msra.mxu0 %v1100_v15  ;;  %1694 = vmatprep.mubr.msk.bf16.mxu0 %vm2108_vm0, %v2107_v0 }
 0x351   : > { %1698 = vmatprep.subr.bf16.mxu1 %v2107_v0 }
 0x352   : > { %v1826_v16 = vpop.eup %1825 }
 0x353   : > { %v947_v17 = vsel %vm732_vm2, %v1826_v16, 0.0  ;;  %v955_v18 = vpack.c.bf16 %v1826_v16, %v1826_v16 }
 0x354   : > { %v1828_v19 = vpop.eup %1827  ;;  %948 = vadd.xlane.f32.xlu0 %v947_v17 }
 0x355   : > { %1689 = vmatmul.mubr.msk.bf16.vlgmr.msra.gmra.mxu1 %vm732_vm2, %v955_v18  ;;  %v950_v20 = vsel %vm732_vm2, %v1828_v19, 0.0  ;;  %v956_v21 = vpack.c.bf16 %v1828_v19, %v1828_v19 }
 0x356   : > { %951 = vadd.xlane.f32.xlu1 %v950_v20  ;;  %1702 = vmatprep.mubr.msk.bf16.mxu1 %vm2108_vm0, %v2107_v0 }
 0x357   : > { %1695 = vmatmul.mubr.msk.bf16.vlgmr.msra.gmra.mxu0 %vm732_vm2, %v956_v21  ;;  %1699 = vmatpush3.bf16.msra.mxu1 %v1819_v22 }
 0x358   : > { %1700 = vmatprep.subr.bf16.mxu1 %v2107_v0 }
 0x3d5   : > { %v943_v24 = vpop.xlane.xlu0 %942 }
 0x3d6   : > { %1829 = vrcp.f32 %v943_v24 }
 0x3d7   : > { %v946_v25 = vpop.xlane.xlu1 %945 }
 0x3d8   : > { %1831 = vrcp.f32 %v946_v25 }
 0x3dd   : > { %v949_v26 = vpop.xlane.xlu0 %948 }
 0x3de   : > { %1833 = vrcp.f32 %v949_v26 }
 0x3df   : > { %v952_v28 = vpop.xlane.xlu1 %951 }
 0x3e0   : > { %1835 = vrcp.f32 %v952_v28 }
 0x3e3   : > { %v1830_v32 = vpop.eup %1829 }
 0x3e5   : > { %v1832_v36 = vpop.eup %1831 }
 0x3eb   : > { %v1834_v0 = vpop.eup %1833 }
 0x3ed   : > { %v1836_v45 = vpop.eup %1835 }
 0x40d   : > { %v998_v29 = vpop.f32.mrf.mxu1 }
 0x40e   : > { %v1146_v35 = vmul.f32 %v1830_v32, %v998_v29 }
 0x40f   : > { %v1678_v30 = vpop.f32.mrf.mxu1  ;;  %v1044_v31 = vpop.f32.mrf.mxu0 }
 0x410   : > { %v1147_v40 = vmul.f32 %v1832_v36, %v1044_v31  ;;  %v1150_v43 = vpack.c.bf16 %v1146_v35, %v1146_v35 }
 0x411   : > { %v1001_v33 = vpop.f32.mrf.mxu1  ;;  %v1684_v34 = vpop.f32.mrf.mxu0 }
 0x412   : > { %v1184_v48 = vpack.c.bf16 %v1147_v40, %v1147_v40  ;;  %v1157_v53 = vrot.slane %v1150_v43, %v2416_v23  ;;  %v1820_v33 = vld [vmem:[#allocation11] sm:$0xff]  }
 0x413   : > { %v1679_v37 = vpop.f32.mrf.mxu1  ;;  %v1047_v39 = vpop.f32.mrf.mxu0  ;;  %1701 = vmatpush3.bf16.msra.mxu1 %v1820_v33 }
 0x414   : > { %v1191_v58 = vrot.slane %v1184_v48, %v2416_v23 }
 0x415   : > { %v1685_v41 = vpop.f32.mrf.mxu0  ;;  %v1090_v42 = vpop.f32.mrf.mxu1 }
 0x416   : > { %v1148_v44 = vmul.f32 %v1834_v0, %v1090_v42 }
 0x417   : > { %v1690_v46 = vpop.f32.mrf.mxu1  ;;  %v1136_v47 = vpop.f32.mrf.mxu0 }
 0x418   : > { %v1158_v49 = vpack.c.bf16 %v1148_v44, %v1148_v44  ;;  %v1149_v50 = vmul.f32 %v1836_v45, %v1136_v47 }
 0x419   : > { %v1093_v51 = vpop.f32.mrf.mxu1  ;;  %v1696_v52 = vpop.f32.mrf.mxu0 }
 0x41a   : > { %v1165_v54 = vrot.slane %v1158_v49, %v2416_v23  ;;  %v1192_v55 = vpack.c.bf16 %v1149_v50, %v1149_v50 }
 0x41b   : > { %v1691_v56 = vpop.f32.mrf.mxu1  ;;  %v1139_v57 = vpop.f32.mrf.mxu0 }
 0x41c   : > { %v1166_v59 = vcombine.low %v1157_v53, %v1165_v54  ;;  %v1167_v60 = vcombine.high %v1157_v53, %v1165_v54  ;;  %v1199_v61 = vrot.slane %v1192_v55, %v2416_v23  ;;  %v1610_v54 = vld [vmem:[%s2624_s22] ss:$0 sm:$0xff] }
 0x41d   : > { %v1697_v62 = vpop.f32.mrf.mxu0 }
 0x41e   : > { %v1174_v63 = vrot.slane %v1166_v59, %v2419_v27  ;;  %v1181_v1 = vrot.slane %v1167_v60, %v2419_v27  ;;  %v1200_v2 = vcombine.low %v1191_v58, %v1199_v61  ;;  %v1201_v3 = vcombine.high %v1191_v58, %v1199_v61 }
 0x420   : > { %v1182_v4 = vcombine.high %v1174_v63, %v2114_v38  ;;  %v1208_v5 = vrot.slane %v1200_v2, %v2419_v27  ;;  %v1215_v6 = vrot.slane %v1201_v3, %v2419_v27  ;;  %v1183_v7 = vcombine.high %v1181_v1, %v2114_v38 }
 0x421   : > { %v1222_v8 = vshrl.u32 %v1174_v63, 16  ;;  %v1238_v14 = vshrl.u32 %v1181_v1, 16 }
 0x422   : > { %v1216_v9 = vcombine.high %v1208_v5, %v2114_v38  ;;  %v1217_v10 = vcombine.high %v1215_v6, %v2114_v38  ;;  %v1220_v11 = vpack.i.b16 %v1208_v5, %v1174_v63  ;;  %v1223_v12 = vshrl.u32 %v1208_v5, 16 }
 0x423   : > { %v1230_v13 = vshrl.u32 %v1182_v4, 16  ;;  %v1236_v15 = vpack.i.b16 %v1215_v6, %v1181_v1  ;;  %v1239_v16 = vshrl.u32 %v1215_v6, 16  ;;  %v1246_v21 = vshrl.u32 %v1183_v7, 16 }
 0x424   : > { %v1224_v17 = vpack.i.b16 %v1223_v12, %v1222_v8  ;;  %v1228_v18 = vpack.i.b16 %v1216_v9, %v1182_v4  ;;  %v1231_v19 = vshrl.u32 %v1216_v9, 16  ;;  %v1244_v20 = vpack.i.b16 %v1217_v10, %v1183_v7 }
 0x425   : > { %v1240_v22 = vpack.i.b16 %v1239_v16, %v1238_v14  ;;  %v1247_v24 = vshrl.u32 %v1217_v10, 16  ;;  %v1250_v25 = vcombine.low %v1220_v11, %v1236_v15 }
 0x426   : > { %v1232_v26 = vpack.i.b16 %v1231_v19, %v1230_v13  ;;  %v1258_v28 = vcombine.low %v1228_v18, %v1244_v20 }
 0x427   : > { %v1248_v29 = vpack.i.b16 %v1247_v24, %v1246_v21  ;;  %v1275_v30 = vcombine.low %v1224_v17, %v1240_v22  ;;  %v1257_v31 = vrot.slane %v1250_v25, %v2416_v23 }
 0x428   : > { %v1265_v32 = vrot.slane %v1258_v28, %v2416_v23 }
 0x429   : > { %v1283_v34 = vcombine.low %v1232_v26, %v1248_v29  ;;  %v1282_v36 = vrot.slane %v1275_v30, %v2416_v23 }
 0x42a   : > { %v1266_v35 = vcombine.low %v1257_v31, %v1265_v32 }
 0x42b   : > { %v1290_v37 = vrot.slane %v1283_v34, %v2416_v23 }
 0x42c   : > { %v1273_v39 = vrot.slane %v1266_v35, %v2419_v27 }
 0x42d   : > { %v1291_v40 = vcombine.low %v1282_v36, %v1290_v37 }
 0x42e   : > { %v1303_v41 = vshrl.u32 %v1273_v39, 16  ;;  %v1274_v43 = vcombine.high %v1273_v39, %v2114_v38 }
 0x42f   : > { %v1298_v0 = vrot.slane %v1291_v40, %v2419_v27 }
 0x430   : > { %v1309_v23 = vshrl.u32 %v1274_v43, 16 }
 0x431   : > { %v1304_v42 = vshrl.u32 %v1298_v0, 16  ;;  %v1299_v44 = vcombine.high %v1298_v0, %v2114_v38  ;;  %v1302_v45 = vpack.i.b16 %v1298_v0, %v1273_v39 }
 0x433   : > { %v1305_v46 = vpack.i.b16 %v1304_v42, %v1303_v41  ;;  %v1308_v47 = vpack.i.b16 %v1299_v44, %v1274_v43  ;;  %v1310_v48 = vshrl.u32 %v1299_v44, 16 }
 0x435   : > { %1312 = vrot.lane.b32.xlu0 %v1305_v46, %s2115_s19  ;;  %1314 = vrot.lane.b32.xlu1 %v1308_v47, %s2116_s12  ;;  %v1311_v49 = vpack.i.b16 %v1310_v48, %v1309_v23 }
 0x439   : > { %1316 = vrot.lane.b32.xlu1 %v1311_v49, %s2117_s21 }
 0x4a7   : > { %v1313_v27 = vpop.permute.xlu0 %1312  ;;  %v1315_v50 = vpop.permute.xlu1 %1314 }
 0x4a8   : > { %v1320_v51 = vsel %vm732_vm2, %v1302_v45, %v1313_v27 }
 0x4a9   : > { %v1323_v38 = vsel %vm1321_vm4, %v1320_v51, %v1315_v50 }
 0x4ab   : > { %v1317_v52 = vpop.permute.xlu1 %1316 }
 0x4ac   : > { %v1326_v53 = vsel %vm1324_vm5, %v1323_v38, %v1317_v52 }
 0x4ad   : > { %1703 = vmatmul.mubr.msk.bf16.vlgmr.msra.gmra.mxu1 %vm519_vm1, %v1326_v53 }
 0x56d   : > { %v1386_v55 = vpop.f32.mrf.mxu1 }
 0x56e   : > { %v1387_v56 = vadd.f32 %v1610_v54, %v1386_v55 }
 0x56f   : > { %v1704_v57 = vpop.f32.mrf.mxu1 }
 0x570   : > { %1392 = vst.msk [vmem:[%s483_s4] sm:$0xff] %vm519_vm1, %v1387_v56 }
 0x571   : > { %v1389_v58 = vpop.f32.mrf.mxu1 }
 0x572   : > { %2014 = shalt.err (!%p2011_p6)
}
 0x573   : > { %s2015_s27 = scalar_lea.hbm %s2519_s14, 128  ;;  %s2019_s19 = scalar_lea.hbm %s2625_s25, 256 }
 0x574   : > { %p2016_p4 = scmp.ne.s32.totalorder %s2519_s14, %s2015_s27  ;;  %p2020_p9 = scmp.lt.s32.totalorder %s2519_s14, %s2625_s25 }
 0x575   : > { %p2021_p5 = scmp.lt.s32.totalorder %s2019_s19, %s2015_s27 }
 0x576   : > { %p2017_p1 = pnand %p2016_p4, %p2216_p8 }
 0x577   : > { %p2022_p2 = por %p2021_p5, %p2020_p9 }
 0x578   : > { %p2018_p12 = pneg %p2017_p1 }
 0x57a   : > { %p2023_p7 = pnand %p2022_p2, %p2018_p12 }
 0x57c   : > { %2026 = shalt.err (!%p2023_p7)
}
 0x57d   : > { %1722 = dma.vmem_to_hbm [thread:$0]  (%p2216_p8), %s2521_s13, 128, %s2519_s14, %s1394_s8   ;;  %v1705_v59 = vpop.f32.mrf.mxu1 }
 0x57e PF: > { %s2626_s21 = sld [smem:[#allocation20_spill]]  ;;  %p2629_p11 = scmp.ge.s32.totalorder %s2097_s10, 2 }
 0x57f   : > { %s2627_s26 = sld [smem:[#allocation23_spill]] }
 0x584   : > { %s1420_s17 = sand.u32 1, %s2626_s21  }
 0x585   : > { %p2628_p10 = scmp.ne.s32.totalorder %s2627_s26, 0  ;;  %s1421_s24 = scalar_lea.sflag [#allocation4], %s1420_s17 }
 0x587   : > { %p1745_p13 = pnand %p2629_p11, %p2628_p10 }
 0x589   : > { %p1746_p3 = pneg %p1745_p13 }
 0x58b   : > { %2072 = dma.done.wait (%p1746_p3), %s1421_s24, 128  }
 0x58c   : > { %2074 = vsyncadd (%p1746_p3), %s1421_s24, 4294967168  ;;  %s31_s10 = sadd.s32 1, %s2097_s10   ;;  %s2630_s20 = sld [smem:[#allocation25_spill]] }
 0x58d   : > { %p28_p0 = scmp.ge.s32.totalorder %s31_s10, 4   ;;  %s2631_s22 = sld [smem:[#allocation24_spill]] }
 0x58e   : > { %s2632_s27 = smov %s2081_s28  ;;  %s2633_s28 = smov %s2085_s29 }
 0x58f   : > { %s2635_s30 = smov %s2093_s9  ;;  %30 = sbr.rel (!%p28_p0) target bundleno = 18 (0x12), region = 142 }
 0x592   : > { %s2634_s29 = smov %s2630_s20 }
 0x593   : > { %s2636_s9 = smov %s2631_s22 }
 0x594   :  { %1426 = vsyncpa [#allocation3], 1 }
 0x595   :  { %1428 = vsyncpa [#allocation3 + $0x1], 1 }
 0x596   :  { %1429 = vsyncpa [#allocation6], 1 }
 0x597   :  { %1431 = vsyncpa [#allocation6 + $0x1], 1 }
 0x598   :  { %1432 = vsyncpa [#allocation9], 1 }
 0x599   :  { %1434 = vsyncpa [#allocation9 + $0x1], 1 }
 0x59a   :  { %1435 = vsyncpa [#allocation12], 1 }
 0x59b   :  { %1436 = vsyncpa [#allocation4], 1 }
 0x59c   :  { %1438 = vsyncpa [#allocation4 + $0x1], 1 }

</bundles_post_ra>
